<compile_context>
chip_gen: v6e
topology: v6e:2x2x1
jax: 0.10.0
libtpu: 0.0.40
codegen_flags: <defaults>
</compile_context>

<pallas_src>
import jax
import jax.numpy as jnp
from jax.experimental import pallas as pl
from jax.experimental.pallas import tpu as pltpu

ROW_TILE_CAP = 2048          # max packed rows per grid step (multiple of 8)
PACK_TARGET_LANES = 256      # pack logical rows until ~256 lanes (v6e/v7x MXU)
_HP = jax.lax.Precision.HIGHEST


def _default_vmem_limit_bytes():
    """Generation-aware scoped-VMEM budget (~3/4 of physical, capped)."""
    try:
        cap = pltpu.get_tpu_info().vmem_capacity_bytes
        return int(min(cap * 3 // 4, 96 * 1024 * 1024))   # v7x ~48 MiB, v5e/v6e 96 MiB
    except Exception:
        return 32 * 1024 * 1024                            # conservative fallback


_VMEM_LIMIT_BYTES = _default_vmem_limit_bytes()


# ---------------------------------------------------------------------------
# Kernel: row-tiled, lane-packed matmul + bias + tanh
#   x block : (TM, R*UNIT_IN)   -- TM physical rows, R logical rows per row
#   w       : (R*UNIT_IN, R*UNIT_OUT)  resident  (kron(I_R, W) block diagonal)
#   b       : (1, R*UNIT_OUT)          resident
# ---------------------------------------------------------------------------
def _rowpack_linear_tanh_kernel(x_ref, w_ref, b_ref, o_ref):
    x = x_ref[...].astype(w_ref.dtype)                     # VPU cast (free slot)
    h = jnp.dot(x, w_ref[...], preferred_element_type=jnp.float32)
    # bias add (VPU) + tanh (EUP) in f32; co-issues with MXU/DMA.
    o_ref[...] = jnp.tanh(h + b_ref[...]).astype(o_ref.dtype)


def _choose_r(unit_in, unit_out, m_hint=None):
    """Logical rows packed per physical row -> ~PACK_TARGET_LANES wide blocks."""
    r = max(1, PACK_TARGET_LANES // max(unit_in, unit_out, 1))
    if m_hint is not None:
        # keep at least 8 packed rows (one f32 sublane group) when m allows
        while r > 1 and -(-m_hint // r) < 8:
            r //= 2
    return r


def _pack_weights(w, b, r, matmul_dtype):
    """kron(I_r, w) / tile(b): lane-dense block-diagonal weight & bias."""
    w_bd = jnp.kron(jnp.eye(r, dtype=jnp.float32), w.astype(jnp.float32))
    b_bd = jnp.tile(b.astype(jnp.float32).reshape(1, -1), (1, r))
    return w_bd.astype(matmul_dtype), b_bd


def _rowpack_linear_tanh(x2d, w_bd, b_bd, r):
    """x2d:(M, UNIT_IN) f32 -> tanh(x2d @ W + b):(M, UNIT_OUT) f32."""
    m, unit_in = x2d.shape
    assert w_bd.shape[0] == r * unit_in
    unit_out = w_bd.shape[1] // r

    m_packed = -(-m // r)
    # single full-extent block when it fits (no forced multi-step grid on
    # single-TC chips); otherwise 2048-row tiles (~85-86% of HBM roofline).
    tm = m_packed if m_packed <= ROW_TILE_CAP else ROW_TILE_CAP
    m_pad = -(-m_packed // tm) * tm
    rows_needed = m_pad * r
    if rows_needed != m:
        x2d = jnp.pad(x2d, ((0, rows_needed - m), (0, 0)))
    xp = x2d.reshape(m_pad, r * unit_in)                   # contiguous reshape

    out = pl.pallas_call(
        _rowpack_linear_tanh_kernel,
        out_shape=jax.ShapeDtypeStruct((m_pad, r * unit_out), jnp.float32),
        grid_spec=pltpu.PrefetchScalarGridSpec(
            num_scalar_prefetch=0,
            grid=(m_pad // tm,),
            in_specs=[
                pl.BlockSpec((tm, r * unit_in), lambda i: (i, 0)),
                pl.BlockSpec((r * unit_in, r * unit_out), lambda i: (0, 0)),  # resident
                pl.BlockSpec((1, r * unit_out), lambda i: (0, 0)),            # resident
            ],
            out_specs=pl.BlockSpec((tm, r * unit_out), lambda i: (i, 0)),
        ),
        compiler_params=pltpu.CompilerParams(
            dimension_semantics=("parallel",),             # pipelining + v7x 2-TC split
            vmem_limit_bytes=_VMEM_LIMIT_BYTES),
    )(xp, w_bd, b_bd)
    return out.reshape(rows_needed, unit_out)[:m]


# ---------------------------------------------------------------------------
# Factory: precompute kernel-ready weights ONCE, return a jitted forward.
# ---------------------------------------------------------------------------
def make_gated_mlp(params, seq_in, *, use_update=True,
                   matmul_dtype=jnp.bfloat16, m_hint=None):
    wu = jnp.asarray(params["update_w"], jnp.float32)      # (S_mid, S_out)
    bu = jnp.asarray(params["update_b"], jnp.float32)      # (1, S_out)
    s_mid, s_out = wu.shape

    if use_update:
        # Reference forward discards the fft branch output when use_update=True,
        # so the whole path is tanh(x @ Wu + bu): one row-packed matmul kernel.
        r = _choose_r(s_mid, s_out, m_hint)
        w_bd, b_bd = _pack_weights(wu, bu, r, matmul_dtype)

        def forward(x):
            B, C, N, s_in = x.shape
            y = _rowpack_linear_tanh(x.reshape(B * C * N, s_in), w_bd, b_bd, r)
            # TODO(synk): nn.Dropout is identity in eval mode; training-mode RNG
            # dropout intentionally not reproduced.
            return y.reshape(B, C, N, s_out)

        return jax.jit(forward)

    # use_update=False: rfft is linear -> fold it and the update Linear into a
    # single per-channel weight, then block-diagonalise over channels so the
    # whole path is ONE lane-dense row-packed matmul (no FFT, no per-channel
    # tiny matmuls, no 16-lane-sparse stores).
    wr = jnp.asarray(params["ur_w"], jnp.float32)          # (C, I, S_mid)
    br = jnp.asarray(params["ur_b"], jnp.float32)          # (C, 1, S_mid)
    wi = jnp.asarray(params["ui_w"], jnp.float32)
    bi = jnp.asarray(params["ui_b"], jnp.float32)
    C, i_dim, _ = wr.shape

    #   real(rfft(x)) = x @ Cos ,  imag(rfft(x)) = -(x @ Sin)
    n_idx = jnp.arange(seq_in, dtype=jnp.float32)[:, None]
    k_idx = jnp.arange(i_dim, dtype=jnp.float32)[None, :]
    ang = (2.0 * jnp.pi / seq_in) * n_idx * k_idx
    cos_m, sin_m = jnp.cos(ang), jnp.sin(ang)              # (S_in, I)
    w_eff = (jnp.einsum('si,cio->cso', cos_m, wr, precision=_HP)
             - jnp.einsum('si,cio->cso', sin_m, wi, precision=_HP))  # (C,S_in,S_mid)
    b_eff = (br + bi)[:, 0, :]                             # (C, S_mid)
    w_full = jnp.einsum('csm,mo->cso', w_eff, wu, precision=_HP)     # (C,S_in,S_out)
    b_full = jnp.einsum('cm,mo->co', b_eff, wu, precision=_HP) + bu  # (C, S_out)

    # Channel block-diagonal weight: (C*S_in, C*S_out), bias (1, C*S_out).
    # TODO(synk): weight grows as (C*S)^2 — fine for moderate C; a per-channel
    # grid axis would be needed for very large C.
    eye_c = jnp.eye(C, dtype=jnp.float32)
    w_cbd = (w_full[:, None] * eye_c[:, :, None, None])    # (C, C, S_in, S_out)
    w_cbd = w_cbd.transpose(0, 2, 1, 3).reshape(C * seq_in, C * s_out)
    b_cbd = b_full.reshape(1, C * s_out)

    r = _choose_r(C * seq_in, C * s_out, m_hint)
    w_bd, b_bd = _pack_weights(w_cbd, b_cbd, r, matmul_dtype)

    def forward(x):
        B, C_, N, s = x.shape
        # one wrapper transpose to channel-last so channels become contiguous lanes
        x2 = x.transpose(0, 2, 1, 3).reshape(B * N, C_ * s)
        y = _rowpack_linear_tanh(x2, w_bd, b_bd, r)
        # TODO(synk): dropout is identity in eval mode; not reproduced.
        return y.reshape(B, N, C_, s_out).transpose(0, 2, 1, 3)

    return jax.jit(forward)


# ---------------------------------------------------------------------------
# Pure-JAX reference (mirrors the PyTorch forward) for tolerance checks
# ---------------------------------------------------------------------------
def _reference_forward(x, params, use_update=True):
    wr, br = params["ur_w"], params["ur_b"]
    wi, bi = params["ui_w"], params["ui_b"]
    xf = jnp.fft.rfft(x, axis=-1)
    h_fft = (jnp.einsum('bcni,cio->bcno', jnp.real(xf), wr, precision=_HP) + br
             + jnp.einsum('bcni,cio->bcno', jnp.imag(xf), wi, precision=_HP) + bi)
    src = x if use_update else h_fft
    h = (jnp.einsum('bcns,st->bcnt', src, params["update_w"], precision=_HP)
         + params["update_b"])
    return jnp.tanh(h)


# ---------------------------------------------------------------------------
# Deterministic parameter init (shapes follow the module __init__)
# ---------------------------------------------------------------------------
def _xavier_uniform(key, shape, fan_in, fan_out):
    a = (6.0 / (fan_in + fan_out)) ** 0.5
    return jax.random.uniform(key, shape, jnp.float32, -a, a)


def init_params(key, seq_in, seq_out, channels):
    I = seq_in // 2 + 1
    k = jax.random.split(key, 6)
    return {
        # Indepent_Linear weights stored as (C, I, O); biases as (C, 1, O)
        "ur_w": _xavier_uniform(k[0], (channels, I, seq_out), I, seq_out),
        "ur_b": _xavier_uniform(k[1], (channels, 1, seq_out), 1, seq_out),
        "ui_w": _xavier_uniform(k[2], (channels, I, seq_out), I, seq_out),
        "ui_b": _xavier_uniform(k[3], (channels, 1, seq_out), 1, seq_out),
        # nn.Linear(seq_out, seq_out): weight pre-transposed to (S_in, S_out)
        "update_w": _xavier_uniform(k[4], (seq_out, seq_out), seq_out, seq_out),
        "update_b": _xavier_uniform(k[5], (1, seq_out), 1, seq_out),
    }


if __name__ == "__main__":
    B, C, N = 2, 4, 8
    seq_in = seq_out = 16   # nn.Linear(seq_out, seq_out) on x requires seq_in == seq_out
    key = jax.random.PRNGKey(0)
    kx, kp = jax.random.split(key)
    x = jax.random.normal(kx, (B, C, N, seq_in), jnp.float32)
    params = init_params(kp, seq_in, seq_out, C)

    for use_update, m_hint in ((True, B * C * N), (False, B * N)):
        ref = _reference_forward(x, params, use_update=use_update)

        # 1) f32-matmul build: tight-tolerance correctness check first.
        fwd32 = make_gated_mlp(params, seq_in, use_update=use_update,
                               matmul_dtype=jnp.float32, m_hint=m_hint)
        y32 = jax.block_until_ready(fwd32(x))
        assert y32.shape == (B, C, N, seq_out)
        assert bool(jnp.all(jnp.isfinite(y32)))
        assert bool(jnp.allclose(y32, ref, atol=2e-3, rtol=2e-3)), \
            f"f32 mismatch (use_update={use_update})"

        # 2) bf16-matmul build (production default): looser tolerance.
        fwd16 = make_gated_mlp(params, seq_in, use_update=use_update,
                               matmul_dtype=jnp.bfloat16, m_hint=m_hint)
        y16 = jax.block_until_ready(fwd16(x))
        assert y16.shape == (B, C, N, seq_out)
        assert bool(jnp.all(jnp.isfinite(y16)))
        assert bool(jnp.allclose(y16, ref, atol=8e-2, rtol=8e-2)), \
            f"bf16 mismatch (use_update={use_update})"

    print("KERNEL_OK")
</pallas_src>

<mosaic_0001>
module attributes {stable_mosaic.version = 11 : i64} {
  func.func @_rowpack_linear_tanh_kernel(%arg0: i32, %arg1: memref<8x128xf32, #tpu.memory_space<vmem>>, %arg2: memref<128x128xf32, #tpu.memory_space<vmem>>, %arg3: memref<1x128xf32, #tpu.memory_space<vmem>>, %arg4: memref<8x128xf32, #tpu.memory_space<vmem>>) attributes {dimension_semantics = [#tpu.dimension_semantics<parallel>], iteration_bounds = array<i64: 1>, scalar_prefetch = 0 : i64, scratch_operands = 0 : i64, tpu.core_type = #tpu.core_type<tc>, window_params = [{transform_indices = @transform_0, window_bounds = array<i64: 8, 128>}, {pipeline_mode = #tpu.pipeline_mode<synchronous>, transform_indices = @transform_1, window_bounds = array<i64: 128, 128>}, {pipeline_mode = #tpu.pipeline_mode<synchronous>, transform_indices = @transform_2, window_bounds = array<i64: 1, 128>}, {transform_indices = @transform_3, window_bounds = array<i64: 8, 128>}]} {
    %c0 = arith.constant 0 : index
    %c0_0 = arith.constant 0 : index
    %0 = vector.load %arg1[%c0, %c0_0] : memref<8x128xf32, #tpu.memory_space<vmem>>, vector<8x128xf32>
    %c0_1 = arith.constant 0 : index
    %c0_2 = arith.constant 0 : index
    %1 = vector.load %arg2[%c0_1, %c0_2] : memref<128x128xf32, #tpu.memory_space<vmem>>, vector<128x128xf32>
    %cst = arith.constant dense<0.000000e+00> : vector<8x128xf32>
    %2 = tpu.matmul %0, %1, %cst {dimension_numbers = #tpu.dot_dimension_numbers<[1], [0], [0], [1], [0, 0, 1, 1], [], []>} : vector<8x128xf32>, vector<128x128xf32>, vector<8x128xf32> -> vector<8x128xf32>
    %c0_3 = arith.constant 0 : index
    %c0_4 = arith.constant 0 : index
    %3 = vector.load %arg3[%c0_3, %c0_4] : memref<1x128xf32, #tpu.memory_space<vmem>>, vector<1x128xf32>
    %4 = vector.broadcast %3 : vector<1x128xf32> to vector<8x128xf32>
    %5 = arith.addf %2, %4 : vector<8x128xf32>
    %6 = math.tanh %5 : vector<8x128xf32>
    %c0_5 = arith.constant 0 : index
    %c0_6 = arith.constant 0 : index
    %7 = vector.load %arg4[%c0_5, %c0_6] : memref<8x128xf32, #tpu.memory_space<vmem>>, vector<8x128xf32>
    tpu.vector_store %arg4[%c0_5, %c0_6], %6 {strides = array<i32>} : memref<8x128xf32, #tpu.memory_space<vmem>>, vector<8x128xf32>,
    return
  }
  func.func @transform_0(%arg0: i32) -> (i32, i32) {
    %c0_i32 = arith.constant 0 : i32
    %c0_i32_0 = arith.constant 0 : i32
    return %arg0, %c0_i32 : i32, i32
  }
  func.func @transform_1(%arg0: i32) -> (i32, i32) {
    %c0_i32 = arith.constant 0 : i32
    %c0_i32_0 = arith.constant 0 : i32
    %c0_i32_1 = arith.constant 0 : i32
    return %c0_i32, %c0_i32_0 : i32, i32
  }
  func.func @transform_2(%arg0: i32) -> (i32, i32) {
    %c0_i32 = arith.constant 0 : i32
    %c0_i32_0 = arith.constant 0 : i32
    %c0_i32_1 = arith.constant 0 : i32
    return %c0_i32, %c0_i32_0 : i32, i32
  }
  func.func @transform_3(%arg0: i32) -> (i32, i32) {
    %c0_i32 = arith.constant 0 : i32
    %c0_i32_0 = arith.constant 0 : i32
    return %arg0, %c0_i32 : i32, i32
  }
}

</mosaic_0001>

<bundles_post_ra>
// kernel: forward.1
= control target key start
LH: loop header
LB: loop body
LE: loop exit
PB: predicated region body
PF: predicated region fallthrough
CT: control target
= control target key end

     0   :  { %8 = vsyncpa [#allocation3], 0  ;;  %s211_s12 = smov [#allocation2]   ;;  %s248_s0 = inlined_call_operand.vmem [shape: f32[8,128], index: 0, kind: input, shape index: {}]   ;;  %s249_s1 = inlined_call_operand.hbm [shape: f32[128,128], index: 1, kind: input, shape index: {}]   ;;  %s250_s2 = inlined_call_operand.vmem [shape: f32[1,128], index: 2, kind: input, shape index: {}]   ;;  %s251_s3 = inlined_call_operand.vmem [shape: f32[8,128], index: 3, kind: output, shape index: {}]  }
   0x1   :  { %s16_s13 = sshll.u32 %s211_s12, 4  ;;  %s17_s13 = int_to_ptr.vmem [resolvable:$true] %s16_s13 }
   0x2   :  { %s197_s14 = scalar_lea.vmem %s17_s13, 2048  ;;  %p202_p1 = scmp.lt.s32.totalorder %s17_s13, %s17_s13 }
   0x3   :  { %p198_p0 = scmp.ne.s32.totalorder %s17_s13, %s197_s14  ;;  %p203_p2 = scmp.lt.s32.totalorder %s197_s14, %s197_s14 }
   0x5   :  { %p204_p3 = por %p203_p2, %p202_p1 }
   0x7   :  { %p205_p4 = pnand %p204_p3, %p198_p0 }
   0x9   :  { %208 = shalt.err (!%p205_p4)
}
   0xa   :  { %s212_s15 = smov 128   ;;  %s213_s16 = smov 8  }
   0xb   :  { %22 = dma.hbm_to_vmem [thread:$0]  %s249_s1, 2048, %s17_s13, [#allocation3], %s212_s15, %s212_s15, %s213_s16  }
   0xc   :  { %209 = dma.done.wait [#allocation3], 2048  }
   0xd   :  { %210 = vsyncadd [#allocation3], 4294965248  ;;  %v214_v0 = vmov 0.0   ;;  %vm215_vm0 = vmmov 0   ;;  %v44_v1 = vld [vmem:[#allocation2 + $0x78] sm:$0xff]  ;;  %v43_v2 = vld [vmem:[#allocation2 + $0x70] sm:$0xff] }
   0xe   :  { %147 = vmatprep.subr.mxu0 %v214_v0  ;;  %179 = vmatprep.mubr.msk.f32.mxu0 %vm215_vm0, %v214_v0  ;;  %v42_v3 = vld [vmem:[#allocation2 + $0x68] sm:$0xff]  ;;  %v41_v4 = vld [vmem:[#allocation2 + $0x60] sm:$0xff]  ;;  %v40_v5 = vld [vmem:[#allocation2 + $0x58] sm:$0xff] }
   0xf   :  { %148 = vmatpush3.msra.mxu0 %v44_v1  ;;  %v39_v6 = vld [vmem:[#allocation2 + $0x50] sm:$0xff]  ;;  %v38_v7 = vld [vmem:[#allocation2 + $0x48] sm:$0xff]  ;;  %v37_v8 = vld [vmem:[#allocation2 + $0x40] sm:$0xff] }
  0x10   :  { %149 = vmatprep.subr.mxu0 %v214_v0  ;;  %v36_v9 = vld [vmem:[#allocation2 + $0x38] sm:$0xff]  ;;  %v35_v10 = vld [vmem:[#allocation2 + $0x30] sm:$0xff]  ;;  %v34_v11 = vld [vmem:[#allocation2 + $0x28] sm:$0xff] }
  0x11   :  { %150 = vmatpush3.msra.mxu0 %v43_v2  ;;  %v33_v12 = vld [vmem:[#allocation2 + $0x20] sm:$0xff]  ;;  %v32_v13 = vld [vmem:[#allocation2 + $0x18] sm:$0xff]  ;;  %v31_v14 = vld [vmem:[#allocation2 + $0x10] sm:$0xff] }
  0x12   :  { %151 = vmatprep.subr.mxu0 %v214_v0  ;;  %v30_v15 = vld [vmem:[#allocation2 + $0x8] sm:$0xff]  ;;  %v29_v16 = vld [vmem:[#allocation2] sm:$0xff] }
  0x13   :  { %152 = vmatpush3.msra.mxu0 %v42_v3  ;;  %v28_v17 = vld [vmem:[%s248_s0] sm:$0xff] }
  0x14   :  { %153 = vmatprep.subr.mxu0 %v214_v0  ;;  %v129_v18 = vld [vmem:[%s250_s2] ss:$0 sm:$0xff] }
  0x15   :  { %154 = vmatpush3.msra.mxu0 %v41_v4 }
  0x16   :  { %155 = vmatprep.subr.mxu0 %v214_v0 }
  0x17   :  { %156 = vmatpush3.msra.mxu0 %v40_v5 }
  0x18   :  { %157 = vmatprep.subr.mxu0 %v214_v0 }
  0x19   :  { %158 = vmatpush3.msra.mxu0 %v39_v6 }
  0x1a   :  { %159 = vmatprep.subr.mxu0 %v214_v0 }
  0x1b   :  { %160 = vmatpush3.msra.mxu0 %v38_v7 }
  0x1c   :  { %161 = vmatprep.subr.mxu0 %v214_v0 }
  0x1d   :  { %162 = vmatpush3.msra.mxu0 %v37_v8 }
  0x1e   :  { %163 = vmatprep.subr.mxu0 %v214_v0 }
  0x1f   :  { %164 = vmatpush3.msra.mxu0 %v36_v9 }
  0x20   :  { %165 = vmatprep.subr.mxu0 %v214_v0 }
  0x21   :  { %166 = vmatpush3.msra.mxu0 %v35_v10 }
  0x22   :  { %167 = vmatprep.subr.mxu0 %v214_v0 }
  0x23   :  { %168 = vmatpush3.msra.mxu0 %v34_v11 }
  0x24   :  { %169 = vmatprep.subr.mxu0 %v214_v0 }
  0x25   :  { %170 = vmatpush3.msra.mxu0 %v33_v12 }
  0x26   :  { %171 = vmatprep.subr.mxu0 %v214_v0 }
  0x27   :  { %172 = vmatpush3.msra.mxu0 %v32_v13 }
  0x28   :  { %173 = vmatprep.subr.mxu0 %v214_v0 }
  0x29   :  { %174 = vmatpush3.msra.mxu0 %v31_v14 }
  0x2a   :  { %175 = vmatprep.subr.mxu0 %v214_v0 }
  0x2b   :  { %176 = vmatpush3.msra.mxu0 %v30_v15 }
  0x2c   :  { %177 = vmatprep.subr.mxu0 %v214_v0 }
  0x2d   :  { %178 = vmatpush3.msra.mxu0 %v29_v16 }
  0x2e   :  { %180 = vmatmul.mubr.f32.vlgmr.msra.gmra.mxu0 %v28_v17 }
  0xee   :  { %v118_v19 = vpop.f32.mrf.mxu0 }
  0xef   :  { %v119_v20 = vadd.f32 %v129_v18, %v118_v19 }
  0xf0   :  { %v181_v21 = vpop.f32.mrf.mxu0 }
  0xf1   :  { %187 = vtanh.f32 %v119_v20 }
  0xfe   :  { %v188_v22 = vpop.eup %187 }
  0xff   :  { %123 = vst [vmem:[%s251_s3] sm:$0xff] %v188_v22 }
 0x100   :  { %128 = vsyncpa [#allocation3], 1 }

</bundles_post_ra>
